<compile_context>
chip_gen: v7x
topology: tpu7x:2x2x1
jax: 0.10.0
libtpu: 0.0.40
codegen_flags: <defaults>
</compile_context>

<pallas_src>
import jax
import jax.numpy as jnp
from jax.experimental import pallas as pl
from jax.experimental.pallas import tpu as pltpu


def _round_up(x, m):
    return ((x + m - 1) // m) * m


def listnet_kernel(x_ref, w1_ref, b1_ref, w2_ref, b2_ref, o_ref):
    # x_ref : (F, TILE_N)  compute dtype (bf16)   -- streamed per batch tile
    # w1_ref: (Hp, F)      compute dtype (bf16)   -- resident
    # b1_ref: (Hp, 1)      f32                    -- resident
    # w2_ref: (Hp, 1)      f32                    -- resident
    # b2_ref: (1,)         f32, SMEM scalar
    # o_ref : (1, TILE_N)  f32, lane-dense output tile
    h = jnp.dot(w1_ref[...], x_ref[...],
                preferred_element_type=jnp.float32)        # (Hp, TILE_N) f32, MXU
    h = jnp.maximum(h + b1_ref[...], 0.0)                  # bias + ReLU, f32 VPU
    # Layer 2: VPU multiply + sublane reduction, f32 accumulation throughout.
    s = jnp.sum(h * w2_ref[...], axis=0, keepdims=True)    # (1, TILE_N) f32
    o_ref[...] = (s + b2_ref[0]).astype(o_ref.dtype)


def listnet_forward(x, w1, b1, w2, b2, *, tile_n=1024,
                    compute_dtype=jnp.bfloat16):
    """ListNet forward pass.

    x : (N, F)   input features
    w1: (F, H)   first Linear weight, stored (in, out)
    b1: (H,)     first Linear bias
    w2: (H, 1)   second Linear weight, stored (in, out)
    b2: (1,)     second Linear bias
    returns (N, 1) logits in x.dtype
    """
    n, f = x.shape
    h_dim = w1.shape[1]
    out_dtype = x.dtype

    # ---- wrapper-side layout plumbing (free w.r.t. the kernel) ----------
    hp = _round_up(max(h_dim, 128), 128)       # full-lane hidden vregs
    tile_n = _round_up(max(tile_n, 128), 128)  # lane-dense batch tile
    n_pad = _round_up(n, 128)
    tile_n = min(tile_n, n_pad)
    n_pad = _round_up(n_pad, tile_n)

    # Transposed / zero-padded parameters.
    w1_t = jnp.zeros((hp, f), jnp.float32).at[:h_dim, :].set(
        w1.T.astype(jnp.float32)).astype(compute_dtype)
    b1_t = jnp.zeros((hp, 1), jnp.float32).at[:h_dim, 0].set(
        b1.reshape(-1).astype(jnp.float32))
    w2_t = jnp.zeros((hp, 1), jnp.float32).at[:h_dim, 0].set(
        w2.reshape(-1).astype(jnp.float32))
    b2_s = jnp.reshape(b2, (1,)).astype(jnp.float32)

    # Transposed, batch-padded activations: (F, N_pad), batch along lanes.
    x_t = jnp.zeros((f, n_pad), compute_dtype).at[:, :n].set(
        x.T.astype(compute_dtype))

    grid = (n_pad // tile_n,)
    out = pl.pallas_call(
        listnet_kernel,
        out_shape=jax.ShapeDtypeStruct((1, n_pad), jnp.float32),
        grid=grid,
        in_specs=[
            pl.BlockSpec((f, tile_n), lambda i: (0, i)),          # x: streamed
            pl.BlockSpec((hp, f), lambda i: (0, 0)),              # w1: resident
            pl.BlockSpec((hp, 1), lambda i: (0, 0)),              # b1: resident
            pl.BlockSpec((hp, 1), lambda i: (0, 0)),              # w2: resident
            pl.BlockSpec(memory_space=pltpu.MemorySpace.SMEM),    # b2: scalar
        ],
        out_specs=pl.BlockSpec((1, tile_n), lambda i: (0, i)),    # lane-dense
        compiler_params=pltpu.CompilerParams(
            dimension_semantics=("parallel",),
        ),
    )(x_t, w1_t, b1_t, w2_t, b2_s)

    return out[0, :n].reshape(n, 1).astype(out_dtype)


def init_params(key, num_input_features, hidden_dim, dtype=jnp.float32):
    """Deterministic init mimicking torch.nn.Linear's uniform(-1/sqrt(fan_in))."""
    k1, k2, k3, k4 = jax.random.split(key, 4)
    lim1 = 1.0 / jnp.sqrt(num_input_features)
    lim2 = 1.0 / jnp.sqrt(hidden_dim)
    w1 = jax.random.uniform(k1, (num_input_features, hidden_dim), dtype, -lim1, lim1)
    b1 = jax.random.uniform(k2, (hidden_dim,), dtype, -lim1, lim1)
    w2 = jax.random.uniform(k3, (hidden_dim, 1), dtype, -lim2, lim2)
    b2 = jax.random.uniform(k4, (1,), dtype, -lim2, lim2)
    return w1, b1, w2, b2


def _reference(x, w1, b1, w2, b2, compute_dtype=jnp.bfloat16):
    # Matches the kernel's numerics: bf16 inputs to layer 1, f32 accumulation,
    # f32 elementwise epilogue and f32 layer-2 reduction.
    xb = x.astype(compute_dtype).astype(jnp.float32)
    w1b = w1.astype(compute_dtype).astype(jnp.float32)
    h = jnp.maximum(
        jnp.dot(xb, w1b, precision=jax.lax.Precision.HIGHEST) + b1[None, :], 0.0)
    return jnp.dot(h, w2, precision=jax.lax.Precision.HIGHEST) + b2[None, :]


if __name__ == "__main__":
    num_input_features = 16
    hidden_dim = 32

    key = jax.random.PRNGKey(0)
    kx, kp, kx2 = jax.random.split(key, 3)
    w1, b1, w2, b2 = init_params(kp, num_input_features, hidden_dim)

    # Small demo shape (single batch tile).
    x = jax.random.normal(kx, (8, num_input_features), jnp.float32)
    logits = listnet_forward(x, w1, b1, w2, b2)
    jax.block_until_ready(logits)
    ref = _reference(x, w1, b1, w2, b2)
    assert logits.shape == (8, 1) and logits.dtype == x.dtype
    assert jnp.allclose(logits, ref, atol=1e-4, rtol=1e-4)

    # Multi-tile path: exercises the pipelined grid + batch padding.
    x2 = jax.random.normal(kx2, (300, num_input_features), jnp.float32)
    logits2 = listnet_forward(x2, w1, b1, w2, b2, tile_n=128)
    jax.block_until_ready(logits2)
    ref2 = _reference(x2, w1, b1, w2, b2)
    assert logits2.shape == (300, 1)
    assert jnp.allclose(logits2, ref2, atol=1e-4, rtol=1e-4)

    print("KERNEL_OK")
</pallas_src>

<mosaic_0001>
module attributes {stable_mosaic.version = 11 : i64} {
  func.func @listnet_kernel(%arg0: i32, %arg1: memref<16x128xbf16, #tpu.memory_space<vmem>>, %arg2: memref<128x16xbf16, #tpu.memory_space<vmem>>, %arg3: memref<128x1xf32, #tpu.memory_space<vmem>>, %arg4: memref<128x1xf32, #tpu.memory_space<vmem>>, %arg5: memref<1xf32, #tpu.memory_space<smem>>, %arg6: memref<1x128xf32, #tpu.memory_space<vmem>>) attributes {dimension_semantics = [#tpu.dimension_semantics<parallel>], iteration_bounds = array<i64: 1>, scalar_prefetch = 0 : i64, scratch_operands = 0 : i64, tpu.core_type = #tpu.core_type<tc>, window_params = [{transform_indices = @transform_0, window_bounds = array<i64: 16, 128>}, {pipeline_mode = #tpu.pipeline_mode<synchronous>, transform_indices = @transform_1, window_bounds = array<i64: 128, 16>}, {pipeline_mode = #tpu.pipeline_mode<synchronous>, transform_indices = @transform_2, window_bounds = array<i64: 128, 1>}, {pipeline_mode = #tpu.pipeline_mode<synchronous>, transform_indices = @transform_3, window_bounds = array<i64: 128, 1>}, {transform_indices = @transform_4, window_bounds = array<i64: 1>}, {transform_indices = @transform_5, window_bounds = array<i64: 1, 128>}]} {
    %c0 = arith.constant 0 : index
    %c0_0 = arith.constant 0 : index
    %0 = vector.load %arg2[%c0, %c0_0] : memref<128x16xbf16, #tpu.memory_space<vmem>>, vector<128x16xbf16>
    %c0_1 = arith.constant 0 : index
    %c0_2 = arith.constant 0 : index
    %1 = vector.load %arg1[%c0_1, %c0_2] : memref<16x128xbf16, #tpu.memory_space<vmem>>, vector<16x128xbf16>
    %cst = arith.constant dense<0.000000e+00> : vector<128x128xf32>
    %2 = tpu.matmul %0, %1, %cst {dimension_numbers = #tpu.dot_dimension_numbers<[1], [0], [0], [1], [0, 0, 1, 1], [], []>} : vector<128x16xbf16>, vector<16x128xbf16>, vector<128x128xf32> -> vector<128x128xf32>
    %c0_3 = arith.constant 0 : index
    %c0_4 = arith.constant 0 : index
    %3 = vector.load %arg3[%c0_3, %c0_4] : memref<128x1xf32, #tpu.memory_space<vmem>>, vector<128x1xf32>
    %4 = vector.broadcast %3 : vector<128x1xf32> to vector<128x128xf32>
    %5 = arith.addf %2, %4 : vector<128x128xf32>
    %cst_5 = arith.constant 0.000000e+00 : f32
    %6 = vector.broadcast %cst_5 : f32 to vector<128x128xf32>
    %7 = arith.maximumf %5, %6 : vector<128x128xf32>
    %c0_6 = arith.constant 0 : index
    %c0_7 = arith.constant 0 : index
    %8 = vector.load %arg4[%c0_6, %c0_7] : memref<128x1xf32, #tpu.memory_space<vmem>>, vector<128x1xf32>
    %9 = vector.broadcast %8 : vector<128x1xf32> to vector<128x128xf32>
    %10 = arith.mulf %7, %9 : vector<128x128xf32>
    %cst_8 = arith.constant dense<0.000000e+00> : vector<128xf32>
    %11 = vector.multi_reduction <add>, %10, %cst_8 [0] : vector<128x128xf32> to vector<128xf32>
    %12 = vector.shape_cast %11 : vector<128xf32> to vector<1x128xf32>
    %c0_9 = arith.constant 0 : index
    %13 = memref.load %arg5[%c0_9] : memref<1xf32, #tpu.memory_space<smem>>
    %14 = vector.broadcast %13 : f32 to vector<1x128xf32>
    %15 = arith.addf %12, %14 : vector<1x128xf32>
    %c0_10 = arith.constant 0 : index
    %c0_11 = arith.constant 0 : index
    %16 = vector.load %arg6[%c0_10, %c0_11] : memref<1x128xf32, #tpu.memory_space<vmem>>, vector<1x128xf32>
    tpu.vector_store %arg6[%c0_10, %c0_11], %15 {strides = array<i32>} : memref<1x128xf32, #tpu.memory_space<vmem>>, vector<1x128xf32>,
    return
  }
  func.func @transform_0(%arg0: i32) -> (i32, i32) {
    %c0_i32 = arith.constant 0 : i32
    %c0_i32_0 = arith.constant 0 : i32
    return %c0_i32, %arg0 : i32, i32
  }
  func.func @transform_1(%arg0: i32) -> (i32, i32) {
    %c0_i32 = arith.constant 0 : i32
    %c0_i32_0 = arith.constant 0 : i32
    %c0_i32_1 = arith.constant 0 : i32
    return %c0_i32, %c0_i32_0 : i32, i32
  }
  func.func @transform_2(%arg0: i32) -> (i32, i32) {
    %c0_i32 = arith.constant 0 : i32
    %c0_i32_0 = arith.constant 0 : i32
    %c0_i32_1 = arith.constant 0 : i32
    return %c0_i32, %c0_i32_0 : i32, i32
  }
  func.func @transform_3(%arg0: i32) -> (i32, i32) {
    %c0_i32 = arith.constant 0 : i32
    %c0_i32_0 = arith.constant 0 : i32
    %c0_i32_1 = arith.constant 0 : i32
    return %c0_i32, %c0_i32_0 : i32, i32
  }
  func.func @transform_4(%arg0: i32) -> i32 {
    %c0_i32 = arith.constant 0 : i32
    %c0_i32_0 = arith.constant 0 : i32
    return %c0_i32 : i32
  }
  func.func @transform_5(%arg0: i32) -> (i32, i32) {
    %c0_i32 = arith.constant 0 : i32
    %c0_i32_0 = arith.constant 0 : i32
    return %c0_i32, %arg0 : i32, i32
  }
}

</mosaic_0001>

<bundles_post_ra>
// kernel: tpu_custom_call.1
= control target key start
LH: loop header
LB: loop body
LE: loop exit
PB: predicated region body
PF: predicated region fallthrough
CT: control target
= control target key end

     0   :  { %v555_v1 = vmov 0   ;;  %vm183_vm0 = vcmask 130048   ;;  %s733_s0 = inlined_call_operand.vmem [shape: bf16[16,128], index: 0, kind: input, shape index: {}]   ;;  %s734_s1 = inlined_call_operand.vmem [shape: bf16[128,16], index: 1, kind: input, shape index: {}]   ;;  %s735_s2 = inlined_call_operand.vmem [shape: f32[128,1], index: 2, kind: input, shape index: {}]   ;;  %s736_s3 = inlined_call_operand.vmem [shape: f32[128,1], index: 3, kind: input, shape index: {}]   ;;  %s737_s4 = inlined_call_operand.<no memory space> [shape: f32[1], index: 4, kind: input, shape index: {}]   ;;  %s738_s5 = inlined_call_operand.hbm [shape: f32[1,128], index: 5, kind: output, shape index: {}]  }
   0x1   :  { %v522_v0 = vld [vmem:[%s733_s0] sm:$0xff]   ;;  %520 = vset.pattern.permute.xlu0 %v555_v1  ;;  %521 = vset.pattern.permute.xlu1 %v555_v1  ;;  %v43_v3 = vld [vmem:[%s735_s2 + $0x10] sm:$0xff]  ;;  %v525_v6 = vld [vmem:[%s734_s1 + $0x8] sm:$0xff]  }
   0x2   :  { %v41_v2 = vld [vmem:[%s735_s2] sm:$0xff]  ;;  %498 = vmatprep.subr.bf16.mxu0 %v522_v0  ;;  %516 = vmatprep.subr.bf16.mxu1 %v522_v0  ;;  %v526_v7 = vld [vmem:[%s734_s1 + $0x28] sm:$0xff]   ;;  %v44_v9 = vld [vmem:[%s735_s2 + $0x18] sm:$0xff] }
   0x3   :  { %v523_v4 = vld [vmem:[%s734_s1] sm:$0xff]   ;;  %59 = vperm.xlu0 %520, %v41_v2   ;;  %499 = vmatpush3.bf16.msra.mxu0 %v522_v0  ;;  %v42_v8 = vld [vmem:[%s735_s2 + $0x8] sm:$0xff]  ;;  %v527_v11 = vld [vmem:[%s734_s1 + $0x10] sm:$0xff]  }
   0x4   :  { %v524_v5 = vld [vmem:[%s734_s1 + $0x20] sm:$0xff]   ;;  %517 = vmatpush3.bf16.msra.mxu1 %v522_v0  ;;  %69 = vperm.xlu1 %521, %v43_v3   ;;  %v528_v12 = vld [vmem:[%s734_s1 + $0x30] sm:$0xff]   ;;  %v322_v13 = vld [vmem:[%s736_s3 + $0x8] sm:$0xff] }
   0x5   :  { %500 = vmatprep.mubr.msk.bf16.mxu0 %vm183_vm0, %v523_v4  ;;  %508 = vmatprep.mubr.msk.bf16.mxu1 %vm183_vm0, %v524_v5  ;;  %v321_v10 = vld [vmem:[%s736_s3] sm:$0xff]  ;;  %v529_v14 = vld [vmem:[%s734_s1 + $0x18] sm:$0xff]   ;;  %v323_v17 = vld [vmem:[%s736_s3 + $0x10] sm:$0xff] }
   0x6   :  { %501 = vmatmul.mubr.msk.bf16.vlgmr.msra.gmra.mrb[0].mxu0 %vm183_vm0, %v525_v6  ;;  %v530_v15 = vld [vmem:[%s734_s1 + $0x38] sm:$0xff]   ;;  %v45_v16 = vld [vmem:[%s735_s2 + $0x20] sm:$0xff]  ;;  %v46_v18 = vld [vmem:[%s735_s2 + $0x28] sm:$0xff] }
   0x7   :  { %509 = vmatmul.mubr.msk.bf16.vlgmr.msra.gmra.mrb[0].mxu1 %vm183_vm0, %v526_v7  ;;  %64 = vperm.xlu0 %520, %v42_v8   ;;  %v324_v19 = vld [vmem:[%s736_s3 + $0x18] sm:$0xff] }
   0x8   :  { %74 = vperm.xlu1 %521, %v44_v9   ;;  %504 = vmatprep.mubr.msk.bf16.mxu0 %vm183_vm0, %v527_v11 }
   0x9   :  { %512 = vmatprep.mubr.msk.bf16.mxu1 %vm183_vm0, %v528_v12 }
   0xb   :  { %339 = vperm.xlu0 %520, %v321_v10  }
   0xc   :  { %344 = vperm.xlu1 %521, %v322_v13  }
   0xe   :  { %505 = vmatmul.mubr.msk.bf16.gmra.mrb[4].mxu0 %vm183_vm0, %v529_v14 }
   0xf   :  { %513 = vmatmul.mubr.msk.bf16.gmra.mrb[4].mxu1 %vm183_vm0, %v530_v15  ;;  %79 = vperm.xlu0 %520, %v45_v16  }
  0x10   :  { %349 = vperm.xlu1 %521, %v323_v17  }
  0x13   :  { %84 = vperm.xlu0 %520, %v46_v18  }
  0x14   :  { %11 = vsyncpa [#allocation4], 0  ;;  %354 = vperm.xlu1 %521, %v324_v19   ;;  %v47_v20 = vld [vmem:[%s735_s2 + $0x30] sm:$0xff]  ;;  %v325_v21 = vld [vmem:[%s736_s3 + $0x20] sm:$0xff]  ;;  %s556_s20 = smov [#allocation3]  }
  0x15   :  { %v48_v22 = vld [vmem:[%s735_s2 + $0x38] sm:$0xff]  ;;  %v326_v23 = vld [vmem:[%s736_s3 + $0x28] sm:$0xff]  ;;  %v49_v24 = vld [vmem:[%s735_s2 + $0x40] sm:$0xff]  ;;  %s464_s21 = sshll.u32 %s556_s20, 4  ;;  %s465_s21 = int_to_ptr.vmem [resolvable:$true] %s464_s21 }
  0x16   :  { %v327_v25 = vld [vmem:[%s736_s3 + $0x30] sm:$0xff]  ;;  %v50_v26 = vld [vmem:[%s735_s2 + $0x48] sm:$0xff]  ;;  %v328_v27 = vld [vmem:[%s736_s3 + $0x38] sm:$0xff]  ;;  %s531_s22 = scalar_lea.vmem %s465_s21, 16  ;;  %s535_s23 = scalar_lea.vmem %s465_s21, 32 }
  0x17   :  { %89 = vperm.xlu0 %520, %v47_v20   ;;  %v51_v28 = vld [vmem:[%s735_s2 + $0x50] sm:$0xff]  ;;  %v329_v29 = vld [vmem:[%s736_s3 + $0x40] sm:$0xff]  ;;  %v52_v30 = vld [vmem:[%s735_s2 + $0x58] sm:$0xff]  ;;  %p532_p0 = scmp.ne.s32.totalorder %s465_s21, %s531_s22  ;;  %p536_p1 = scmp.lt.s32.totalorder %s465_s21, %s465_s21 }
  0x18   :  { %359 = vperm.xlu1 %521, %v325_v21   ;;  %v330_v31 = vld [vmem:[%s736_s3 + $0x48] sm:$0xff]  ;;  %v53_v32 = vld [vmem:[%s735_s2 + $0x60] sm:$0xff]  ;;  %v331_v33 = vld [vmem:[%s736_s3 + $0x50] sm:$0xff]  ;;  %p537_p2 = scmp.lt.s32.totalorder %s535_s23, %s531_s22 }
  0x19   :  { %v54_v34 = vld [vmem:[%s735_s2 + $0x68] sm:$0xff]  ;;  %v332_v35 = vld [vmem:[%s736_s3 + $0x58] sm:$0xff]  ;;  %v55_v36 = vld [vmem:[%s735_s2 + $0x70] sm:$0xff] }
  0x1a   :  { %v333_v37 = vld [vmem:[%s736_s3 + $0x60] sm:$0xff]  ;;  %v56_v38 = vld [vmem:[%s735_s2 + $0x78] sm:$0xff]  ;;  %v334_v39 = vld [vmem:[%s736_s3 + $0x68] sm:$0xff]  ;;  %p538_p3 = por %p537_p2, %p536_p1 }
  0x1b   :  { %94 = vperm.xlu0 %520, %v48_v22   ;;  %v335_v40 = vld [vmem:[%s736_s3 + $0x70] sm:$0xff]  ;;  %v336_v41 = vld [vmem:[%s736_s3 + $0x78] sm:$0xff] }
  0x1c   :  { %364 = vperm.xlu1 %521, %v326_v23   ;;  %p539_p4 = pnand %p538_p3, %p532_p0 }
  0x1f   :  { %99 = vperm.xlu0 %520, %v49_v24  }
  0x20   :  { %369 = vperm.xlu1 %521, %v327_v25  }
  0x23   :  { %104 = vperm.xlu0 %520, %v50_v26  }
  0x24   :  { %374 = vperm.xlu1 %521, %v328_v27  }
  0x27   :  { %109 = vperm.xlu0 %520, %v51_v28  }
  0x28   :  { %379 = vperm.xlu1 %521, %v329_v29  }
  0x2b   :  { %114 = vperm.xlu0 %520, %v52_v30  }
  0x2c   :  { %384 = vperm.xlu1 %521, %v330_v31  }
  0x2f   :  { %119 = vperm.xlu0 %520, %v53_v32  }
  0x30   :  { %389 = vperm.xlu1 %521, %v331_v33  }
  0x33   :  { %124 = vperm.xlu0 %520, %v54_v34  }
  0x34   :  { %394 = vperm.xlu1 %521, %v332_v35  }
  0x37   :  { %129 = vperm.xlu0 %520, %v55_v36  }
  0x38   :  { %399 = vperm.xlu1 %521, %v333_v37  }
  0x3b   :  { %134 = vperm.xlu0 %520, %v56_v38  }
  0x3c   :  { %404 = vperm.xlu1 %521, %v334_v39  }
  0x3f   :  { %409 = vperm.xlu0 %520, %v335_v40  }
  0x40   :  { %414 = vperm.xlu1 %521, %v336_v41  }
  0x82   :  { %v60_v42 = vpop.permute.xlu0 %59 }
  0x83   :  { %v70_v43 = vpop.permute.xlu1 %69 }
  0x86   :  { %v65_v44 = vpop.permute.xlu0 %64 }
  0x87   :  { %v75_v45 = vpop.permute.xlu1 %74 }
  0x8a   :  { %v340_v46 = vpop.permute.xlu0 %339 }
  0x8b   :  { %v345_v47 = vpop.permute.xlu1 %344 }
  0x8e   :  { %v80_v48 = vpop.permute.xlu0 %79 }
  0x8f   :  { %v350_v49 = vpop.permute.xlu1 %349 }
  0x92   :  { %v85_v50 = vpop.permute.xlu0 %84 }
  0x93   :  { %v355_v51 = vpop.permute.xlu1 %354 }
  0x96   :  { %v90_v52 = vpop.permute.xlu0 %89 }
  0x97   :  { %v360_v53 = vpop.permute.xlu1 %359 }
  0x9a   :  { %v95_v54 = vpop.permute.xlu0 %94 }
  0x9b   :  { %v365_v55 = vpop.permute.xlu1 %364 }
  0x9e   :  { %v100_v56 = vpop.permute.xlu0 %99 }
  0x9f   :  { %v370_v57 = vpop.permute.xlu1 %369 }
  0xa2   :  { %v105_v58 = vpop.permute.xlu0 %104 }
  0xa3   :  { %v375_v59 = vpop.permute.xlu1 %374 }
  0xa6   :  { %v110_v60 = vpop.permute.xlu0 %109 }
  0xa7   :  { %v380_v61 = vpop.permute.xlu1 %379 }
  0xaa   :  { %v115_v62 = vpop.permute.xlu0 %114 }
  0xab   :  { %v385_v12 = vpop.permute.xlu1 %384 }
  0xae   :  { %v120_v15 = vpop.permute.xlu0 %119 }
  0xaf   :  { %v390_v30 = vpop.permute.xlu1 %389 }
  0xd9   :  { %v502_v63 = vpop.f32.mrb[0].mxu0 }
  0xda   :  { %v510_v0 = vpop.f32.mrb[0].mxu1  ;;  %v242_v1 = vpop.f32.mrb[1].mxu0  ;;  %v251_v2 = vadd.f32 %v502_v63, %v70_v43 }
  0xdb   :  { %v243_v3 = vadd.f32 %v242_v1, %v60_v42  ;;  %v274_v4 = vpop.f32.mrb[1].mxu1  ;;  %v503_v5 = vpop.f32.mrb[2].mxu0 }
  0xdc   :  { %v511_v6 = vpop.f32.mrb[2].mxu1  ;;  %v245_v7 = vpop.f32.mrb[3].mxu0  ;;  %v254_v9 = vadd.f32 %v503_v5, %v75_v45  ;;  %v307_v13 = vmax.f32 %v251_v2, 0.0  ;;  %v275_v39 = vadd.f32 %v274_v4, %v100_v56 }
  0xdd   :  { %v305_v8 = vmax.f32 %v243_v3, 0.0  ;;  %v246_v10 = vadd.f32 %v245_v7, %v65_v44  ;;  %v277_v11 = vpop.f32.mrb[3].mxu1  ;;  %v125_v42 = vpop.permute.xlu0 %124  ;;  %v286_v63 = vadd.f32 %v511_v6, %v115_v62 }
  0xde   :  { %v308_v17 = vmax.f32 %v254_v9, 0.0  ;;  %v419_v22 = vmul.f32 %v350_v49, %v307_v13  ;;  %v278_v44 = vadd.f32 %v277_v11, %v105_v58  ;;  %v313_v49 = vmax.f32 %v275_v39, 0.0 }
  0xdf   :  { %v306_v14 = vmax.f32 %v246_v10, 0.0  ;;  %v417_v16 = vmul.f32 %v340_v46, %v305_v8  ;;  %v316_v7 = vmax.f32 %v286_v63, 0.0 }
  0xe0   :  { %v420_v31 = vmul.f32 %v355_v51, %v308_v17  ;;  %v314_v1 = vmax.f32 %v278_v44, 0.0  ;;  %v425_v3 = vmul.f32 %v380_v61, %v313_v49 }
  0xe1   :  { %v418_v18 = vmul.f32 %v345_v47, %v306_v14  ;;  %v506_v19 = vpop.f32.mrb[4].mxu0  ;;  %v395_v47 = vpop.permute.xlu1 %394 }
  0xe2   :  { %v514_v20 = vpop.f32.mrb[4].mxu1  ;;  %v258_v21 = vpop.f32.mrb[5].mxu0  ;;  %v267_v27 = vadd.f32 %v506_v19, %v90_v52  ;;  %v426_v8 = vmul.f32 %v385_v12, %v314_v1  ;;  %v428_v11 = vmul.f32 %v395_v47, %v316_v7 }
  0xe3   :  { %v433_v23 = vadd.f32 %v418_v18, %v417_v16  ;;  %v259_v24 = vadd.f32 %v258_v21, %v80_v48  ;;  %v290_v25 = vpop.f32.mrb[5].mxu1  ;;  %v507_v26 = vpop.f32.mrb[6].mxu0  ;;  %v283_v48 = vadd.f32 %v510_v0, %v110_v60 }
  0xe4   :  { %v515_v28 = vpop.f32.mrb[6].mxu1  ;;  %v261_v29 = vpop.f32.mrb[7].mxu0  ;;  %v270_v35 = vadd.f32 %v507_v26, %v95_v54  ;;  %v311_v40 = vmax.f32 %v267_v27, 0.0  ;;  %v291_v56 = vadd.f32 %v290_v25, %v120_v15 }
  0xe5   :  { %v434_v32 = vadd.f32 %v433_v23, %v419_v22  ;;  %v309_v33 = vmax.f32 %v259_v24, 0.0  ;;  %v293_v34 = vpop.f32.mrb[7].mxu1  ;;  %v262_v36 = vadd.f32 %v261_v29, %v85_v50  ;;  %v130_v50 = vpop.permute.xlu0 %129 }
  0xe6   :  { %v312_v45 = vmax.f32 %v270_v35, 0.0  ;;  %v423_v52 = vmul.f32 %v370_v57, %v311_v40  ;;  %v400_v5 = vpop.permute.xlu1 %399  ;;  %v294_v9 = vadd.f32 %v293_v34, %v125_v42  ;;  %v299_v10 = vadd.f32 %v514_v20, %v130_v50 }
  0xe7   :  { %v421_v37 = vmul.f32 %v360_v53, %v309_v33  ;;  %v435_v38 = vadd.f32 %v434_v32, %v420_v31  ;;  %v310_v41 = vmax.f32 %v262_v36, 0.0  ;;  %v315_v53 = vmax.f32 %v283_v48, 0.0 }
  0xe8   :  { %v424_v2 = vmul.f32 %v375_v59, %v312_v45  ;;  %v317_v60 = vmax.f32 %v291_v56, 0.0  ;;  %v318_v6 = vmax.f32 %v294_v9, 0.0  ;;  %v319_v14 = vmax.f32 %v299_v10, 0.0 }
  0xe9   :  { %v436_v43 = vadd.f32 %v435_v38, %v421_v37  ;;  %v422_v46 = vmul.f32 %v365_v55, %v310_v41  ;;  %v427_v55 = vmul.f32 %v390_v30, %v315_v53  ;;  %v135_v57 = vpop.permute.xlu0 %134  ;;  %v455_v30 = vstv %s737_s4 }
  0xea   :  { %v302_v62 = vadd.f32 %v515_v28, %v135_v57  ;;  %v405_v13 = vpop.permute.xlu1 %404  ;;  %v429_v16 = vmul.f32 %v400_v5, %v317_v60 }
  0xeb   :  { %v437_v51 = vadd.f32 %v436_v43, %v422_v46  ;;  %v430_v17 = vmul.f32 %v405_v13, %v318_v6 }
  0xec   :  { %v320_v15 = vmax.f32 %v302_v62, 0.0 }
  0xed   :  { %v438_v54 = vadd.f32 %v437_v51, %v423_v52  ;;  %v410_v19 = vpop.permute.xlu0 %409 }
  0xee   :  { %v431_v12 = vmul.f32 %v410_v19, %v319_v14  ;;  %v415_v22 = vpop.permute.xlu1 %414 }
  0xef   :  { %v439_v4 = vadd.f32 %v438_v54, %v424_v2  ;;  %v432_v23 = vmul.f32 %v415_v22, %v320_v15 }
  0xf1   :  { %v440_v58 = vadd.f32 %v439_v4, %v425_v3 }
  0xf3   :  { %v441_v0 = vadd.f32 %v440_v58, %v426_v8 }
  0xf5   :  { %v442_v59 = vadd.f32 %v441_v0, %v427_v55 }
  0xf7   :  { %v443_v61 = vadd.f32 %v442_v59, %v428_v11 }
  0xf9   :  { %v444_v18 = vadd.f32 %v443_v61, %v429_v16 }
  0xfb   :  { %v445_v21 = vadd.f32 %v444_v18, %v430_v17 }
  0xfd   :  { %v446_v20 = vadd.f32 %v445_v21, %v431_v12 }
  0xff   :  { %v447_v24 = vadd.f32 %v446_v20, %v432_v23 }
 0x101   :  { %v448_v25 = vrot.slane %v447_v24, 4 }
 0x103   :  { %v449_v26 = vadd.f32 %v448_v25, %v447_v24 }
 0x105   :  { %v450_v27 = vrot.slane %v449_v26, 2 }
 0x107   :  { %v451_v28 = vadd.f32 %v450_v27, %v449_v26 }
 0x109   :  { %v452_v29 = vrot.slane %v451_v28, 1 }
 0x10b   :  { %v453_v31 = vadd.f32 %v452_v29, %v451_v28 }
 0x10d   :  { %v456_v32 = vadd.f32 %v455_v30, %v453_v31 }
 0x10f   :  { %457 = vst [vmem:[#allocation3] sm:$0x1] %v456_v32 }
 0x110   :  { %542 = shalt.err (!%p539_p4)
}
 0x111   :  { %s543_s0 = scalar_lea.hbm %s738_s5, 16 }
 0x112   :  { %p544_p5 = scmp.ne.s32.totalorder %s738_s5, %s543_s0  ;;  %p547_p6 = scmp.lt.u32.totalorder %s543_s0, %s738_s5 }
 0x114   :  { %p549_p7 = pnand %p547_p6, %p544_p5 }
 0x116   :  { %552 = shalt.err (!%p549_p7)
}
 0x117   :  { %467 = dma.vmem_to_hbm [thread:$0]  %s465_s21, 16, %s738_s5, [#allocation4]  }
 0x118   :  { %553 = dma.done.wait [#allocation4], 16  }
 0x119   :  { %554 = vsyncadd [#allocation4], 4294967280 }
 0x11a   :  { %471 = vsyncpa [#allocation4], 1 }

</bundles_post_ra>
